<compile_context>
chip_gen: v7x
topology: tpu7x:2x2x1
jax: 0.10.0
libtpu: 0.0.40
codegen_flags: <defaults>
</compile_context>

<pallas_src>
import jax
import jax.numpy as jnp
from jax import lax
from jax.experimental import pallas as pl
from jax.experimental.pallas import tpu as pltpu


def _l2_normalize(v):
    """Row-wise L2 normalize with torch.nn.functional.normalize semantics."""
    sq = jnp.sum(v * v, axis=-1, keepdims=True)             # (rows, 1)
    inv = pl.reciprocal(jnp.maximum(jnp.sqrt(sq), 1e-12))   # exact recip, per row
    return v * inv


def _contrastive_kernel(x_ref, neg_ref, pos_idx_ref, neg_mask_ref, o_ref):
    x = x_ref[...].astype(jnp.float32)                 # (B, E)
    neg = neg_ref[...].astype(jnp.float32)             # (Nneg, E)
    pos_index = pos_idx_ref[...].astype(jnp.float32)   # (B, B)
    neg_mask = neg_mask_ref[...].astype(jnp.float32)   # (B, Nneg), {0, 1}

    B = x.shape[0]

    x_n = _l2_normalize(x)                              # (B, E)
    neg_n = _l2_normalize(neg)                          # (Nneg, E)

    # Transposed-RHS contraction (contract dim 1 with dim 1): MXU consumes the
    # RHS transposed natively -> no XLU transpose / extra VMEM copy.
    dn = (((1,), (1,)), ((), ()))
    x_b = x_n.astype(jnp.bfloat16)
    n_b = neg_n.astype(jnp.bfloat16)
    sim_pos = lax.dot_general(x_b, x_b, dimension_numbers=dn,
                              preferred_element_type=jnp.float32)   # (B, B)
    sim_neg = lax.dot_general(x_b, n_b, dimension_numbers=dn,
                              preferred_element_type=jnp.float32)   # (B, Nneg)

    # Positive term.  torch broadcast: (-1 / pos_index.sum(-1)) scales the
    # similarity product along its LAST axis (per column j).  Row-sums of
    # pos_index are needed in lane orientation (1, B); get them with a
    # ones-row contraction instead of a transpose (0/1 inputs + f32 accumulate
    # -> exact integer sums).
    ones8 = jnp.ones((8, B), dtype=jnp.float32)
    rowsum8 = lax.dot_general(ones8, pos_index, dimension_numbers=dn,
                              preferred_element_type=jnp.float32)   # (8, B)
    col_scale = -pl.reciprocal(rowsum8[0:1, :])                      # (1, B)
    pos_total = jnp.sum(sim_pos * pos_index * col_scale)             # = sum_i pos[i]

    # Negative term.  torch: log(exp(sim) * mask)[mask].sum(); selected entries
    # are untouched by the mask multiply and log(exp(s)) == s, so this is
    # exactly a masked sum of sim (no transcendentals needed).
    neg_total = jnp.sum(sim_neg * neg_mask)

    # loss = mean_i(pos[i] + neg_total) = mean(pos) + neg_total
    o_ref[0, 0] = pos_total * (1.0 / B) + neg_total


def contrastive_loss_general(x, pos_set, neg_set, pos_index, neg_index):
    """x: (B, E); pos_set: (Npos, E) [unused by the original forward];
    neg_set: (Nneg, E); pos_index: (B, B); neg_index: (B, Nneg) bool/0-1.
    Returns the scalar loss (float32)."""
    del pos_set  # the original forward overwrites it with F.normalize(x)

    B, E = x.shape
    Nneg = neg_set.shape[0]

    x = x.astype(jnp.float32)
    neg_set = neg_set.astype(jnp.float32)
    pos_index = pos_index.astype(jnp.float32)
    neg_mask = neg_index.astype(jnp.float32)

    # Zero-pad the embedding dim to a lane-dense multiple of 128; zero columns
    # change neither the L2 norms nor the dot products.
    E_pad = ((E + 127) // 128) * 128
    if E_pad != E:
        x = jnp.pad(x, ((0, 0), (0, E_pad - E)))
        neg_set = jnp.pad(neg_set, ((0, 0), (0, E_pad - E)))

    cost = pl.CostEstimate(
        flops=(2 * B * B * E_pad + 2 * B * Nneg * E_pad + 2 * 8 * B * B
               + 3 * (B + Nneg) * E_pad + 6 * B * B + 4 * B * Nneg),
        transcendentals=2 * B + Nneg,        # reciprocals (norms + column scale)
        bytes_accessed=4 * (B * E_pad + Nneg * E_pad + B * B + B * Nneg + 1),
    )

    out = pl.pallas_call(
        _contrastive_kernel,
        out_shape=jax.ShapeDtypeStruct((1, 1), jnp.float32),
        in_specs=[
            pl.BlockSpec((B, E_pad), lambda: (0, 0)),
            pl.BlockSpec((Nneg, E_pad), lambda: (0, 0)),
            pl.BlockSpec((B, B), lambda: (0, 0)),
            pl.BlockSpec((B, Nneg), lambda: (0, 0)),
        ],
        out_specs=pl.BlockSpec(memory_space=pltpu.MemorySpace.SMEM),
        cost_estimate=cost,
    )(x, neg_set, pos_index, neg_mask)
    return out[0, 0]


def _reference(x, pos_set, neg_set, pos_index, neg_index):
    """Pure-JAX mirror of the PyTorch forward (for sanity checking)."""
    del pos_set  # overwritten by the original forward

    def normalize(v, eps=1e-12):
        n = jnp.sqrt(jnp.sum(v * v, axis=-1, keepdims=True))
        return v / jnp.maximum(n, eps)

    x_n = normalize(x.astype(jnp.float32))
    neg_n = normalize(neg_set.astype(jnp.float32))
    pos_index = pos_index.astype(jnp.float32)

    # (x.unsqueeze(1) * pos_set.unsqueeze(0)).sum(-1) == x_n @ x_n.T
    prod = x_n @ x_n.T
    prod = prod * pos_index
    pos = (-1.0 / jnp.sum(pos_index, axis=-1)) * prod   # torch broadcast: scale along last axis
    pos = jnp.sum(pos, axis=-1)                          # (B,)

    sim_neg = x_n @ neg_n.T
    prod2 = jnp.exp(sim_neg) * neg_index.astype(jnp.float32)
    # torch: log(prod2[neg_index]).sum() — masked entries are unchanged by the
    # mask multiply, so a masked sum of the log is identical.
    neg = jnp.sum(jnp.where(neg_index,
                            jnp.log(jnp.where(neg_index, prod2, 1.0)), 0.0))

    return jnp.mean(pos + neg)


if __name__ == "__main__":
    key = jax.random.PRNGKey(0)
    B, E, Npos, Nneg = 8, 32, 8, 16
    k1, k2, k3, k4, k5 = jax.random.split(key, 5)

    x = jax.random.normal(k1, (B, E), dtype=jnp.float32)
    pos_set = jax.random.normal(k2, (Npos, E), dtype=jnp.float32)   # unused by the forward
    neg_set = jax.random.normal(k3, (Nneg, E), dtype=jnp.float32)
    pos_index = (jax.random.uniform(k4, (B, B)) > 0.5).astype(jnp.float32)
    pos_index = pos_index.at[jnp.arange(B), jnp.arange(B)].set(1.0)  # keep row sums > 0
    neg_index = jax.random.uniform(k5, (B, Nneg)) > 0.5

    loss = contrastive_loss_general(x, pos_set, neg_set, pos_index, neg_index)
    jax.block_until_ready(loss)

    ref = _reference(x, pos_set, neg_set, pos_index, neg_index)
    # Tolerance covers the bf16-input / f32-accumulate MXU contraction inside
    # the kernel vs. the full-f32 reference matmul; any structural error in
    # the loss formula shows up at O(0.1) or larger.
    assert jnp.allclose(loss, ref, rtol=1e-2, atol=1e-2), (loss, ref)

    print("KERNEL_OK")
</pallas_src>

<mosaic_0001>
module attributes {stable_mosaic.version = 11 : i64} {
  func.func @_contrastive_kernel(%arg0: memref<8x128xf32, #tpu.memory_space<vmem>>, %arg1: memref<16x128xf32, #tpu.memory_space<vmem>>, %arg2: memref<8x8xf32, #tpu.memory_space<vmem>>, %arg3: memref<8x16xf32, #tpu.memory_space<vmem>>, %arg4: memref<1x1xf32, #tpu.memory_space<smem>>) attributes {dimension_semantics = [], scalar_prefetch = 0 : i64, scratch_operands = 0 : i64, tpu.core_type = #tpu.core_type<tc>} {
    %c0 = arith.constant 0 : index
    %c0_0 = arith.constant 0 : index
    %0 = vector.load %arg0[%c0, %c0_0] : memref<8x128xf32, #tpu.memory_space<vmem>>, vector<8x128xf32>
    %c0_1 = arith.constant 0 : index
    %c0_2 = arith.constant 0 : index
    %1 = vector.load %arg1[%c0_1, %c0_2] : memref<16x128xf32, #tpu.memory_space<vmem>>, vector<16x128xf32>
    %c0_3 = arith.constant 0 : index
    %c0_4 = arith.constant 0 : index
    %2 = vector.load %arg2[%c0_3, %c0_4] : memref<8x8xf32, #tpu.memory_space<vmem>>, vector<8x8xf32>
    %c0_5 = arith.constant 0 : index
    %c0_6 = arith.constant 0 : index
    %3 = vector.load %arg3[%c0_5, %c0_6] : memref<8x16xf32, #tpu.memory_space<vmem>>, vector<8x16xf32>
    %4 = arith.mulf %0, %0 : vector<8x128xf32>
    %cst = arith.constant dense<0.000000e+00> : vector<8xf32>
    %5 = vector.multi_reduction <add>, %4, %cst [1] : vector<8x128xf32> to vector<8xf32>
    %6 = vector.shape_cast %5 : vector<8xf32> to vector<8x1xf32>
    %7 = math.sqrt %6 : vector<8x1xf32>
    %cst_7 = arith.constant 9.99999996E-13 : f32
    %8 = vector.broadcast %cst_7 : f32 to vector<8x1xf32>
    %9 = arith.maximumf %7, %8 : vector<8x1xf32>
    %10 = tpu.reciprocal %9 : vector<8x1xf32> -> vector<8x1xf32>
    %11 = vector.broadcast %10 : vector<8x1xf32> to vector<8x128xf32>
    %12 = arith.mulf %0, %11 : vector<8x128xf32>
    %13 = arith.mulf %1, %1 : vector<16x128xf32>
    %cst_8 = arith.constant dense<0.000000e+00> : vector<16xf32>
    %14 = vector.multi_reduction <add>, %13, %cst_8 [1] : vector<16x128xf32> to vector<16xf32>
    %15 = vector.shape_cast %14 : vector<16xf32> to vector<16x1xf32>
    %16 = math.sqrt %15 : vector<16x1xf32>
    %cst_9 = arith.constant 9.99999996E-13 : f32
    %17 = vector.broadcast %cst_9 : f32 to vector<16x1xf32>
    %18 = arith.maximumf %16, %17 : vector<16x1xf32>
    %19 = tpu.reciprocal %18 : vector<16x1xf32> -> vector<16x1xf32>
    %20 = vector.broadcast %19 : vector<16x1xf32> to vector<16x128xf32>
    %21 = arith.mulf %1, %20 : vector<16x128xf32>
    %22 = arith.truncf %12 : vector<8x128xf32> to vector<8x128xbf16>
    %23 = arith.truncf %21 : vector<16x128xf32> to vector<16x128xbf16>
    %cst_10 = arith.constant dense<0.000000e+00> : vector<8x8xf32>
    %24 = tpu.matmul %22, %22, %cst_10 {dimension_numbers = #tpu.dot_dimension_numbers<[1], [1], [0], [0], [0, 0, 1, 0], [], []>} : vector<8x128xbf16>, vector<8x128xbf16>, vector<8x8xf32> -> vector<8x8xf32>
    %cst_11 = arith.constant dense<0.000000e+00> : vector<8x16xf32>
    %25 = tpu.matmul %22, %23, %cst_11 {dimension_numbers = #tpu.dot_dimension_numbers<[1], [1], [0], [0], [0, 0, 1, 0], [], []>} : vector<8x128xbf16>, vector<16x128xbf16>, vector<8x16xf32> -> vector<8x16xf32>
    %cst_12 = arith.constant 1.000000e+00 : f32
    %26 = vector.broadcast %cst_12 : f32 to vector<8x8xf32>
    %cst_13 = arith.constant dense<0.000000e+00> : vector<8x8xf32>
    %27 = tpu.matmul %26, %2, %cst_13 {dimension_numbers = #tpu.dot_dimension_numbers<[1], [1], [0], [0], [0, 0, 1, 0], [], []>} : vector<8x8xf32>, vector<8x8xf32>, vector<8x8xf32> -> vector<8x8xf32>
    %28 = vector.extract_strided_slice %27 {offsets = [0, 0], sizes = [1, 8], strides = [1, 1]} : vector<8x8xf32> to vector<1x8xf32>
    %29 = tpu.reciprocal %28 : vector<1x8xf32> -> vector<1x8xf32>
    %cst_14 = arith.constant 0.000000e+00 : f32
    %30 = vector.broadcast %cst_14 : f32 to vector<1x8xf32>
    %31 = arith.subf %30, %29 : vector<1x8xf32>
    %32 = arith.mulf %24, %2 : vector<8x8xf32>
    %33 = vector.broadcast %31 : vector<1x8xf32> to vector<8x8xf32>
    %34 = arith.mulf %32, %33 : vector<8x8xf32>
    %35 = vector.shape_cast %34 : vector<8x8xf32> to vector<1x8x8xf32>
    %cst_15 = arith.constant dense<0.000000e+00> : vector<1xf32>
    %36 = vector.multi_reduction <add>, %35, %cst_15 [1, 2] : vector<1x8x8xf32> to vector<1xf32>
    %37 = vector.shape_cast %36 : vector<1xf32> to vector<1x1x1xf32>
    %38 = vector.extract %37[0, 0, 0] : f32 from vector<1x1x1xf32>
    %39 = arith.mulf %25, %3 : vector<8x16xf32>
    %40 = vector.shape_cast %39 : vector<8x16xf32> to vector<1x8x16xf32>
    %cst_16 = arith.constant dense<0.000000e+00> : vector<1xf32>
    %41 = vector.multi_reduction <add>, %40, %cst_16 [1, 2] : vector<1x8x16xf32> to vector<1xf32>
    %42 = vector.shape_cast %41 : vector<1xf32> to vector<1x1x1xf32>
    %43 = vector.extract %42[0, 0, 0] : f32 from vector<1x1x1xf32>
    %cst_17 = arith.constant 1.250000e-01 : f32
    %44 = arith.mulf %38, %cst_17 : f32
    %45 = arith.addf %44, %43 : f32
    %c0_18 = arith.constant 0 : index
    %c0_19 = arith.constant 0 : index
    %46 = memref.load %arg4[%c0_18, %c0_19] : memref<1x1xf32, #tpu.memory_space<smem>>
    memref.store %45, %arg4[%c0_18, %c0_19] : memref<1x1xf32, #tpu.memory_space<smem>>
    return
  }
}

</mosaic_0001>

<bundles_post_ra>
// kernel: tpu_custom_call.1
= control target key start
LH: loop header
LB: loop body
LE: loop exit
PB: predicated region body
PF: predicated region fallthrough
CT: control target
= control target key end

     0   :  { %9 = vsyncpa [#allocation3], 0  ;;  %s533_s0 = inlined_call_operand.hbm [shape: f32[8,128], index: 0, kind: input, shape index: {}]   ;;  %s534_s1 = inlined_call_operand.hbm [shape: f32[16,128], index: 1, kind: input, shape index: {}]   ;;  %s535_s2 = inlined_call_operand.hbm [shape: f32[8,8], index: 2, kind: input, shape index: {}]   ;;  %s536_s3 = inlined_call_operand.vmem [shape: f32[8,16], index: 3, kind: input, shape index: {}]   ;;  %s537_s4 = inlined_call_operand.hbm [shape: f32[1,1], index: 4, kind: output, shape index: {}]  }
   0x1   :  { %10 = vsyncpa [#allocation6], 0 }
   0x2   :  { %11 = vsyncpa [#allocation4], 0  ;;  %s442_s15 = smov [#allocation5]   ;;  %s360_s19 = scalar_lea.hbm %s534_s1, 256 }
   0x3   :  { %s27_s16 = sshll.u32 %s442_s15, 4  ;;  %p361_p0 = scmp.ne.s32.totalorder %s534_s1, %s360_s19  ;;  %s28_s16 = int_to_ptr.vmem [resolvable:$true] %s27_s16 }
   0x4   :  { %p364_p1 = scmp.lt.u32.totalorder %s360_s19, %s534_s1 }
   0x6   :  { %p366_p2 = pnand %p364_p1, %p361_p0 }
   0x8   :  { %369 = shalt.err (!%p366_p2)
}
   0x9   :  { %s370_s24 = scalar_lea.vmem %s28_s16, 256  ;;  %p375_p4 = scmp.lt.s32.totalorder %s28_s16, %s28_s16 }
   0xa   :  { %p371_p3 = scmp.ne.s32.totalorder %s28_s16, %s370_s24  ;;  %p376_p5 = scmp.lt.s32.totalorder %s370_s24, %s370_s24 }
   0xc   :  { %p377_p6 = por %p376_p5, %p375_p4 }
   0xe   :  { %p378_p7 = pnand %p377_p6, %p371_p3 }
  0x10   :  { %381 = shalt.err (!%p378_p7)
}
  0x11   :  { %s443_s25 = smov 128   ;;  %s444_s26 = smov 8  }
  0x12   :  { %33 = dma.hbm_to_vmem [thread:$0]  %s534_s1, 256, %s28_s16, [#allocation6], %s443_s25, %s443_s25, %s444_s26  }
  0x13   :  { %s445_s29 = smov [#allocation2]   ;;  %s446_s5 = smov [#allocation7]  }
  0x14   :  { %s18_s30 = sshll.u32 %s445_s29, 4  ;;  %s40_s6 = sshll.u32 %s446_s5, 4  ;;  %s19_s30 = int_to_ptr.vmem [resolvable:$true] %s18_s30  ;;  %s41_s6 = int_to_ptr.vmem [resolvable:$true] %s40_s6 }
  0x15   :  { %s382_s9 = scalar_lea.hbm %s533_s0, 128 }
  0x16   :  { %p383_p8 = scmp.ne.s32.totalorder %s533_s0, %s382_s9  ;;  %p386_p9 = scmp.lt.u32.totalorder %s382_s9, %s533_s0 }
  0x18   :  { %p388_p10 = pnand %p386_p9, %p383_p8 }
  0x1a   :  { %391 = shalt.err (!%p388_p10)
}
  0x1b   :  { %s392_s1 = scalar_lea.vmem %s19_s30, 128  ;;  %p397_p12 = scmp.lt.s32.totalorder %s19_s30, %s19_s30 }
  0x1c   :  { %p393_p11 = scmp.ne.s32.totalorder %s19_s30, %s392_s1  ;;  %p398_p13 = scmp.lt.s32.totalorder %s392_s1, %s392_s1 }
  0x1e   :  { %p399_p0 = por %p398_p13, %p397_p12 }
  0x20   :  { %p400_p1 = pnand %p399_p0, %p393_p11 }
  0x22   :  { %403 = shalt.err (!%p400_p1)
}
  0x23   :  { %21 = dma.hbm_to_vmem [thread:$0]  %s533_s0, 128, %s19_s30, [#allocation3]  }
  0x24   :  { %s404_s18 = scalar_lea.hbm %s535_s2, 128 }
  0x25   :  { %p405_p2 = scmp.ne.s32.totalorder %s535_s2, %s404_s18  ;;  %p408_p3 = scmp.lt.u32.totalorder %s404_s18, %s535_s2 }
  0x27   :  { %p410_p4 = pnand %p408_p3, %p405_p2 }
  0x29   :  { %413 = shalt.err (!%p410_p4)
}
  0x2a   :  { %s414_s23 = scalar_lea.vmem %s41_s6, 128  ;;  %p419_p6 = scmp.lt.s32.totalorder %s41_s6, %s41_s6 }
  0x2b   :  { %p415_p5 = scmp.ne.s32.totalorder %s41_s6, %s414_s23  ;;  %p420_p7 = scmp.lt.s32.totalorder %s414_s23, %s414_s23 }
  0x2d   :  { %p421_p8 = por %p420_p7, %p419_p6 }
  0x2f   :  { %p422_p9 = pnand %p421_p8, %p415_p5 }
  0x31   :  { %425 = shalt.err (!%p422_p9)
}
  0x32   :  { %43 = dma.hbm_to_vmem [thread:$0]  %s535_s2, 128, %s41_s6, [#allocation6]  }
  0x33   :  { %436 = dma.done.wait [#allocation3], 128  }
  0x34   :  { %437 = vsyncadd [#allocation3], 4294967168 }
  0x35   :  { %438 = dma.done.wait [#allocation6], 384  }
  0x36   :  { %439 = vsyncadd [#allocation6], 4294966912  ;;  %v56_v0 = vld [vmem:[#allocation2] sm:$0xff]  ;;  %v58_v1 = vld [vmem:[#allocation5 + $0x8] sm:$0xff]  ;;  %v447_v6 = vmov 0.0   ;;  %vm448_vm0 = vmmov 0   ;;  %v262_v51 = vlaneseq }
  0x37   :  { %v57_v2 = vld [vmem:[#allocation5] sm:$0xff]  ;;  %v61_v3 = vmul.f32 %v56_v0, %v56_v0  ;;  %v75_v4 = vmul.f32 %v58_v1, %v58_v1  ;;  %316 = vmatprep.subr.bf16.mxu0 %v447_v6  ;;  %322 = vmatprep.subr.bf16.mxu1 %v447_v6  ;;  %v59_v36 = vld [vmem:[#allocation7] sm:$0xff]  ;;  %vm182_vm7 = vcmask 64512   ;;  %v449_v37 = vmov 1.0   ;;  %v60_v41 = vld [vmem:[%s536_s3] sm:$0xff]  ;;  %s426_s5 = scalar_lea.hbm %s537_s4, 16 }
  0x38   :  { %v74_v5 = vmul.f32 %v57_v2, %v57_v2  ;;  %318 = vmatprep.mubr.msk.bf16.mxu0 %vm448_vm0, %v447_v6  ;;  %324 = vmatprep.mubr.msk.bf16.mxu1 %vm448_vm0, %v447_v6  ;;  %vm278_vm8 = vcmask 130048   ;;  %v263_v52 = vshrl.u32 %v262_v51, 7  ;;  %p427_p10 = scmp.ne.s32.totalorder %s537_s4, %s426_s5  ;;  %p430_p11 = scmp.lt.u32.totalorder %s426_s5, %s537_s4 }
  0x39   :  { %62 = vadd.xlane.f32.xlu0 %v61_v3  ;;  %78 = vadd.xlane.f32.xlu1 %v75_v4 }
  0x3a   :  { %v264_v53 = vsub.s32 0, %v263_v52  ;;  %p432_p12 = pnand %p430_p11, %p427_p10 }
  0x3d   :  { %76 = vadd.xlane.f32.xlu0 %v74_v5 }
  0xc6   :  { %v63_v7 = vpop.xlane.xlu0 %62  ;;  %v79_v8 = vpop.xlane.xlu1 %78 }
  0xc7   :  { %346 = vrsqrt.f32 %v63_v7  ;;  %vm89_vm1 = vcmp.eq.f32.partialorder %v79_v8, inf  ;;  %v92_v13 = vand.u32 2147483648, %v79_v8  ;;  %vm66_vm2 = vcmp.eq.f32.partialorder %v63_v7, inf }
  0xc8   :  { %348 = vrsqrt.f32 %v79_v8  ;;  %v69_v14 = vand.u32 2147483648, %v63_v7  ;;  %vm91_vm3 = vcmp.eq.f32.partialorder %v79_v8, 0.0  ;;  %vm68_vm4 = vcmp.eq.f32.partialorder %v63_v7, 0.0 }
  0xca   :  { %v77_v9 = vpop.xlane.xlu0 %76 }
  0xcb   :  { %350 = vrsqrt.f32 %v77_v9  ;;  %vm82_vm5 = vcmp.eq.f32.partialorder %v77_v9, inf  ;;  %v85_v20 = vand.u32 2147483648, %v77_v9  ;;  %vm84_vm6 = vcmp.eq.f32.partialorder %v77_v9, 0.0 }
  0xd1   :  { %v347_v10 = vpop.eup %346 }
  0xd2   :  { %v349_v11 = vpop.eup %348  ;;  %v65_v12 = vmul.f32 %v347_v10, %v63_v7 }
  0xd3   :  { %v88_v15 = vmul.f32 %v349_v11, %v79_v8 }
  0xd4   :  { %v67_v16 = vsel %vm66_vm2, %v63_v7, %v65_v12 }
  0xd5   :  { %v351_v17 = vpop.eup %350  ;;  %v70_v18 = vsel %vm68_vm4, %v69_v14, %v67_v16  ;;  %v90_v19 = vsel %vm89_vm1, %v79_v8, %v88_v15 }
  0xd6   :  { %v71_v21 = vmax.f32 %v70_v18, 1e-12  ;;  %v93_v22 = vsel %vm91_vm3, %v92_v13, %v90_v19  ;;  %v81_v23 = vmul.f32 %v351_v17, %v77_v9 }
  0xd7   :  { %v95_v24 = vmax.f32 %v93_v22, 1e-12 }
  0xd8   :  { %352 = vrcp.f32 %v71_v21  ;;  %v83_v25 = vsel %vm82_vm5, %v77_v9, %v81_v23 }
  0xd9   :  { %v86_v26 = vsel %vm84_vm6, %v85_v20, %v83_v25  ;;  %354 = vrcp.f32 %v95_v24 }
  0xda   :  { %v94_v27 = vmax.f32 %v86_v26, 1e-12 }
  0xdc   :  { %356 = vrcp.f32 %v94_v27 }
  0xe2   :  { %v353_v28 = vpop.eup %352 }
  0xe3   :  { %v355_v29 = vpop.eup %354  ;;  %v73_v30 = vmul.f32 %v353_v28, %v56_v0 }
  0xe4   :  { %v99_v32 = vmul.f32 %v355_v29, %v58_v1 }
  0xe5   :  { %v100_v31 = vpack.c.bf16 %v73_v30, %v73_v30 }
  0xe6   :  { %v357_v33 = vpop.eup %356 }
  0xe7   :  { %317 = vmatpush3.bf16.xpose.msra.mxu0 %v100_v31  ;;  %v98_v34 = vmul.f32 %v357_v33, %v57_v2 }
  0xe8   :  { %328 = vmatprep.subr.mxu0 %v447_v6 }
  0xe9   :  { %v101_v35 = vpack.c.bf16 %v99_v32, %v98_v34 }
  0xeb   :  { %323 = vmatpush3.bf16.xpose.msra.mxu1 %v101_v35 }
  0xee   :  { %319 = vmatmul.mubr.bf16.vlgmr.msra.gmra.mrb[0].mxu0 %v100_v31 }
  0xef   :  { %329 = vmatpush3.xpose.msk.msra.mxu0 %vm182_vm7, %v59_v36  ;;  %330 = vmatprep.mubr.msk.f32.mxu0 %vm448_vm0, %v447_v6 }
  0xf2   :  { %325 = vmatmul.mubr.bf16.vlgmr.msra.gmra.mrb[0].mxu1 %v100_v31 }
  0xf6   :  { %331 = vmatmul.mubr.msk.f32.vlgmr.msra.gmra.mrb[4].mxu0 %vm182_vm7, %v449_v37 }
 0x1c1   :  { %v136_v38 = vpop.f32.mrb[0].mxu0 }
 0x1c2   :  { %v320_v39 = vpop.f32.mrb[1].mxu0  ;;  %v261_v56 = vmul.f32 %v136_v38, %v59_v36 }
 0x1c3   :  { %v139_v40 = vpop.f32.mrb[2].mxu0 }
 0x1c4   :  { %v321_v42 = vpop.f32.mrb[3].mxu0 }
 0x1c5   :  { %v176_v43 = vpop.f32.mrb[0].mxu1 }
 0x1c6   :  { %v277_v44 = vmul.f32 %v176_v43, %v60_v41  ;;  %v326_v45 = vpop.f32.mrb[1].mxu1 }
 0x1c7   :  { %v179_v46 = vpop.f32.mrb[2].mxu1 }
 0x1c8   :  { %v327_v47 = vpop.f32.mrb[3].mxu1  ;;  %v279_v48 = vsel %vm278_vm8, %v277_v44, 0.0 }
 0x1c9   :  { %v255_v49 = vpop.f32.mrb[4].mxu0  ;;  %280 = vadd.xlane.f32.xlu0 %v279_v48 }
 0x1ca   :  { %358 = vrcp.f32 %v255_v49  ;;  %v332_v50 = vpop.f32.mrb[5].mxu0 }
 0x1d4   :  { %v359_v54 = vpop.eup %358 }
 0x1d5   :  { %v260_v55 = vsub.f32 0.0, %v359_v54 }
 0x1d7   :  { %v265_v57 = vrot.slane %v260_v55, %v264_v53 }
 0x1d9   :  { %v266_v58 = vmul.f32 %v265_v57, %v261_v56 }
 0x1db   :  { %v267_v59 = vsel %vm182_vm7, %v266_v58, 0.0 }
 0x1dc   :  { %268 = vadd.xlane.f32.xlu1 %v267_v59 }
 0x256   :  { %v281_v60 = vpop.xlane.xlu0 %280 }
 0x257   :  { %v282_v61 = vrot.slane %v281_v60, 4 }
 0x259   :  { %v283_v62 = vadd.f32 %v282_v61, %v281_v60 }
 0x25b   :  { %v284_v63 = vrot.slane %v283_v62, 2 }
 0x25d   :  { %v285_v3 = vadd.f32 %v284_v63, %v283_v62 }
 0x25f   :  { %v286_v6 = vrot.slane %v285_v3, 1 }
 0x261   :  { %v287_v9 = vadd.f32 %v286_v6, %v285_v3 }
 0x269   :  { %v269_v0 = vpop.xlane.xlu1 %268 }
 0x26a   :  { %v270_v1 = vrot.slane %v269_v0, 4 }
 0x26c   :  { %v271_v2 = vadd.f32 %v270_v1, %v269_v0 }
 0x26e   :  { %v272_v4 = vrot.slane %v271_v2, 2 }
 0x270   :  { %v273_v5 = vadd.f32 %v272_v4, %v271_v2 }
 0x272   :  { %v274_v7 = vrot.slane %v273_v5, 1 }
 0x274   :  { %v275_v8 = vadd.f32 %v274_v7, %v273_v5 }
 0x276   :  { %333 = vpush %v275_v8 }
 0x277   :  { %335 = vpush %v287_v9 }
 0x2a7   :  { %s334_s3 = spop %333 }
 0x2a8   :  { %s289_s26 = smul.f32 0.125, %s334_s3  ;;  %s336_s27 = spop %335 }
 0x2aa   :  { %s290_s28 = sadd.f32 %s336_s27, %s289_s26 }
 0x2ac   :  { %292 = sst [smem:[#allocation8]] %s290_s28 }
 0x2ad   :  { %435 = shalt.err (!%p432_p12)
}
 0x2ae   :  { %s450_s10 = smov [#allocation8]  }
 0x2af   :  { %300 = dma.smem_to_hbm %s450_s10, 16, %s537_s4, [#allocation4]  }
 0x2b0   :  { %440 = dma.done.wait [#allocation4], 16  }
 0x2b1   :  { %441 = vsyncadd [#allocation4], 4294967280 }
 0x2b2   :  { %304 = sfence }
 0x2b3   :  { %305 = vsyncpa [#allocation3], 1 }
 0x2b4   :  { %306 = vsyncpa [#allocation6], 1 }
 0x2b5   :  { %307 = vsyncpa [#allocation4], 1 }

</bundles_post_ra>
